<compile_context>
chip_gen: v7x
topology: tpu7x:2x2x1
jax: 0.10.0
libtpu: 0.0.40
codegen_flags: <defaults>
</compile_context>

<pallas_src>
import functools
import math

import jax
import jax.numpy as jnp
from jax.experimental import pallas as pl
from jax.experimental.pallas import tpu as pltpu


def _dibs_particles_kernel(x_ref, wt_ref, v_ref, b_ref, o_ref, *, n_particles):
    """One batch tile, all particles fused.

    x_ref : (TB, n_in)            batch tile
    wt_ref: (P, n_in, k)          pre-transposed sampled_w (resident)
    v_ref : (P, k, n_out)         sampled_v (resident)
    b_ref : (1, P * n_out)        lane-dense packed bias (resident, f32)
    o_ref : (TB, P * n_out)       lane-dense packed output tile
    """
    x = x_ref[...]

    # Stage 1 (tiny): W_eff_p = w_p^T @ v_p, computed from the pre-transposed
    # operand so no transpose is materialized in the kernel.  Static unroll
    # over the (small) particle count; concatenated along lanes into the
    # (n_in, P*n_out) effective weight.
    cols = [
        jnp.dot(wt_ref[p], v_ref[p], preferred_element_type=jnp.float32)
        for p in range(n_particles)
    ]
    w_all = cols[0] if n_particles == 1 else jnp.concatenate(cols, axis=-1)

    # Stage 2 (bulk): lane-dense fused GEMM + bias add (f32 accumulate on MXU,
    # f32 add on VPU — also the right choice for v5e, which has no bf16 VPU).
    y = jnp.dot(x, w_all, preferred_element_type=jnp.float32) + b_ref[...]
    o_ref[...] = y.astype(o_ref.dtype)


def dibs_forward_particles(x, w_p, v_p, b_p, *, block_batch=512,
                           compute_dtype=None):
    """Fused DiBS forward for P weight samples sharing one input batch.

    x   : (batch, n_in)
    w_p : (P, k, n_in)     sampled_w per particle
    v_p : (P, k, n_out)    sampled_v per particle
    b_p : (P, n_out)       sampled_b per particle
    Returns (batch, P * n_out); columns [p*n_out:(p+1)*n_out] hold particle p's
    output  x @ (w_p^T @ v_p) + b_p.
    """
    batch, n_in = x.shape
    n_particles, k_hidden, n_in_w = w_p.shape
    assert n_in_w == n_in
    p_v, k_v, n_out = v_p.shape
    assert (p_v, k_v) == (n_particles, k_hidden)
    assert b_p.shape == (n_particles, n_out)

    out_dtype = x.dtype

    # Batch tile: big tiles amortize the ~0.35us/step overhead; keep full batch
    # as one block if it does not divide evenly (fine for small batches).
    tb = min(block_batch, batch)
    if batch % tb != 0:
        tb = batch
    grid = (batch // tb,)

    # Hoisted, lane-dense operand prep (once per weight sample, plain XLA):
    #  - pre-transpose sampled_w so the kernel never transposes,
    #  - pack the bias as a single (1, P*n_out) f32 row.
    w_t = jnp.swapaxes(w_p, 1, 2)                            # (P, n_in, k)
    b_all = b_p.reshape(1, n_particles * n_out).astype(jnp.float32)

    if compute_dtype is not None:
        x_c = x.astype(compute_dtype)
        w_c = w_t.astype(compute_dtype)
        v_c = v_p.astype(compute_dtype)
    else:
        x_c, w_c, v_c = x, w_t, v_p

    kernel = functools.partial(_dibs_particles_kernel, n_particles=n_particles)

    out = pl.pallas_call(
        kernel,
        out_shape=jax.ShapeDtypeStruct((batch, n_particles * n_out), out_dtype),
        grid=grid,
        in_specs=[
            pl.BlockSpec((tb, n_in), lambda i: (i, 0)),                 # x tile
            pl.BlockSpec((n_particles, n_in, k_hidden), lambda i: (0, 0, 0)),
            pl.BlockSpec((n_particles, k_hidden, n_out), lambda i: (0, 0, 0)),
            pl.BlockSpec((1, n_particles * n_out), lambda i: (0, 0)),   # bias
        ],
        out_specs=pl.BlockSpec((tb, n_particles * n_out), lambda i: (i, 0)),
        compiler_params=pltpu.CompilerParams(
            # Every batch tile is independent (W_all is recomputed per tile),
            # so the axis can be sharded across both TensorCores on v7x.
            dimension_semantics=("parallel",),
        ),
    )(x_c, w_c, v_c, b_all)
    return out


def dibs_forward(x, sampled_w, sampled_v, sampled_b, *, compute_dtype=None):
    """Exact DibsLayer.forward (pre_train, with_bias) for one weight sample.

    NOTE: at truly tiny single-sample shapes the pallas_call launch overhead
    dominates; prefer `dibs_forward_particles` with many weight samples (the
    realistic DiBS workload) or plain XLA (`dibs_forward_ref`) for one-offs.
    """
    return dibs_forward_particles(
        x, sampled_w[None], sampled_v[None], sampled_b[None],
        compute_dtype=compute_dtype)            # (batch, n_outputs)


# ------------------------- pure-JAX references -------------------------------

def dibs_forward_ref(x, sampled_w, sampled_v, sampled_b):
    """Direct translation of the PyTorch forward."""
    sampled_weights = jnp.matmul(sampled_w.T, sampled_v).T   # (n_out, n_in)
    return jnp.matmul(x, sampled_weights.T) + sampled_b


def dibs_forward_particles_ref(x, w_p, v_p, b_p):
    w_eff = jnp.einsum("pki,pko->pio", w_p, v_p)             # (P, n_in, n_out)
    y = jnp.einsum("bi,pio->bpo", x, w_eff) + b_p[None, :, :]
    return y.reshape(x.shape[0], -1)                         # packed like kernel


# ------------------------------- demo ----------------------------------------

if __name__ == "__main__":
    # Small shapes consistent with the module: n_inputs=16, n_outputs=16,
    # k_hidden=32, batch=8; 8 particles so the packed output is 128 lanes wide.
    n_inputs, n_outputs, k_hidden = 16, 16, 32
    batch, n_particles = 8, 8

    key = jax.random.PRNGKey(0)
    kx, kw, kv, kb = jax.random.split(key, 4)

    # kaiming_uniform_(a=sqrt(5)) on (fan_out, fan_in) == U(-1/sqrt(fan_in), ...)
    bound_w = 1.0 / math.sqrt(n_inputs)
    bound_v = 1.0 / math.sqrt(n_outputs)
    x = jax.random.normal(kx, (batch, n_inputs), dtype=jnp.float32)
    w_p = jax.random.uniform(kw, (n_particles, k_hidden, n_inputs),
                             jnp.float32, -bound_w, bound_w)
    v_p = jax.random.uniform(kv, (n_particles, k_hidden, n_outputs),
                             jnp.float32, -bound_v, bound_v)
    b_p = jax.random.uniform(kb, (n_particles, n_outputs),
                             jnp.float32, -bound_v, bound_v)

    # 1) Batched multi-particle forward (main path), f32.
    y = jax.block_until_ready(dibs_forward_particles(x, w_p, v_p, b_p))
    y_ref = dibs_forward_particles_ref(x, w_p, v_p, b_p)
    assert y.shape == (batch, n_particles * n_outputs)
    assert jnp.allclose(y, y_ref, atol=1e-5, rtol=1e-5), "particle mismatch"

    # 2) Single weight-sample forward — matches DibsLayer.forward exactly.
    y1 = jax.block_until_ready(dibs_forward(x, w_p[0], v_p[0], b_p[0]))
    y1_ref = dibs_forward_ref(x, w_p[0], v_p[0], b_p[0])
    assert y1.shape == (batch, n_outputs)
    assert jnp.allclose(y1, y1_ref, atol=1e-5, rtol=1e-5), "single mismatch"

    # 3) bf16 inputs, f32 accumulation (v6e/v7x MXU path).
    y_bf = jax.block_until_ready(
        dibs_forward_particles(x, w_p, v_p, b_p, compute_dtype=jnp.bfloat16))
    assert jnp.allclose(y_bf.astype(jnp.float32), y_ref,
                        atol=5e-2, rtol=5e-2), "bf16 mismatch"

    # TODO(synk): sample()/kl_with_prior()/h_acyclic()/get_graph() (training-time
    # reparameterized sampling, KL and acyclicity penalty) are not part of the
    # pre_train forward hot path and are not implemented as kernels.
    print("KERNEL_OK")
</pallas_src>

<mosaic_0001>
module attributes {stable_mosaic.version = 11 : i64} {
  func.func @_dibs_particles_kernel(%arg0: i32, %arg1: memref<8x16xf32, #tpu.memory_space<vmem>>, %arg2: memref<8x16x32xf32, #tpu.memory_space<vmem>>, %arg3: memref<8x32x16xf32, #tpu.memory_space<vmem>>, %arg4: memref<1x128xf32, #tpu.memory_space<vmem>>, %arg5: memref<8x128xf32, #tpu.memory_space<vmem>>) attributes {dimension_semantics = [#tpu.dimension_semantics<parallel>], iteration_bounds = array<i64: 1>, scalar_prefetch = 0 : i64, scratch_operands = 0 : i64, tpu.core_type = #tpu.core_type<tc>, window_params = [{transform_indices = @transform_0, window_bounds = array<i64: 8, 16>}, {pipeline_mode = #tpu.pipeline_mode<synchronous>, transform_indices = @transform_1, window_bounds = array<i64: 8, 16, 32>}, {pipeline_mode = #tpu.pipeline_mode<synchronous>, transform_indices = @transform_2, window_bounds = array<i64: 8, 32, 16>}, {pipeline_mode = #tpu.pipeline_mode<synchronous>, transform_indices = @transform_3, window_bounds = array<i64: 1, 128>}, {transform_indices = @transform_4, window_bounds = array<i64: 8, 128>}]} {
    %c0 = arith.constant 0 : index
    %c0_0 = arith.constant 0 : index
    %0 = vector.load %arg1[%c0, %c0_0] : memref<8x16xf32, #tpu.memory_space<vmem>>, vector<8x16xf32>
    %c0_1 = arith.constant 0 : index
    %c0_2 = arith.constant 0 : index
    %c0_3 = arith.constant 0 : index
    %1 = vector.load %arg2[%c0_1, %c0_2, %c0_3] : memref<8x16x32xf32, #tpu.memory_space<vmem>>, vector<1x16x32xf32>
    %2 = vector.shape_cast %1 : vector<1x16x32xf32> to vector<16x32xf32>
    %c0_4 = arith.constant 0 : index
    %c0_5 = arith.constant 0 : index
    %c0_6 = arith.constant 0 : index
    %3 = vector.load %arg3[%c0_4, %c0_5, %c0_6] : memref<8x32x16xf32, #tpu.memory_space<vmem>>, vector<1x32x16xf32>
    %4 = vector.shape_cast %3 : vector<1x32x16xf32> to vector<32x16xf32>
    %cst = arith.constant dense<0.000000e+00> : vector<16x16xf32>
    %5 = tpu.matmul %2, %4, %cst {dimension_numbers = #tpu.dot_dimension_numbers<[1], [0], [0], [1], [0, 0, 1, 1], [], []>} : vector<16x32xf32>, vector<32x16xf32>, vector<16x16xf32> -> vector<16x16xf32>
    %c1 = arith.constant 1 : index
    %c0_7 = arith.constant 0 : index
    %c0_8 = arith.constant 0 : index
    %6 = vector.load %arg2[%c1, %c0_7, %c0_8] : memref<8x16x32xf32, #tpu.memory_space<vmem>>, vector<1x16x32xf32>
    %7 = vector.shape_cast %6 : vector<1x16x32xf32> to vector<16x32xf32>
    %c1_9 = arith.constant 1 : index
    %c0_10 = arith.constant 0 : index
    %c0_11 = arith.constant 0 : index
    %8 = vector.load %arg3[%c1_9, %c0_10, %c0_11] : memref<8x32x16xf32, #tpu.memory_space<vmem>>, vector<1x32x16xf32>
    %9 = vector.shape_cast %8 : vector<1x32x16xf32> to vector<32x16xf32>
    %cst_12 = arith.constant dense<0.000000e+00> : vector<16x16xf32>
    %10 = tpu.matmul %7, %9, %cst_12 {dimension_numbers = #tpu.dot_dimension_numbers<[1], [0], [0], [1], [0, 0, 1, 1], [], []>} : vector<16x32xf32>, vector<32x16xf32>, vector<16x16xf32> -> vector<16x16xf32>
    %c2 = arith.constant 2 : index
    %c0_13 = arith.constant 0 : index
    %c0_14 = arith.constant 0 : index
    %11 = vector.load %arg2[%c2, %c0_13, %c0_14] : memref<8x16x32xf32, #tpu.memory_space<vmem>>, vector<1x16x32xf32>
    %12 = vector.shape_cast %11 : vector<1x16x32xf32> to vector<16x32xf32>
    %c2_15 = arith.constant 2 : index
    %c0_16 = arith.constant 0 : index
    %c0_17 = arith.constant 0 : index
    %13 = vector.load %arg3[%c2_15, %c0_16, %c0_17] : memref<8x32x16xf32, #tpu.memory_space<vmem>>, vector<1x32x16xf32>
    %14 = vector.shape_cast %13 : vector<1x32x16xf32> to vector<32x16xf32>
    %cst_18 = arith.constant dense<0.000000e+00> : vector<16x16xf32>
    %15 = tpu.matmul %12, %14, %cst_18 {dimension_numbers = #tpu.dot_dimension_numbers<[1], [0], [0], [1], [0, 0, 1, 1], [], []>} : vector<16x32xf32>, vector<32x16xf32>, vector<16x16xf32> -> vector<16x16xf32>
    %c3 = arith.constant 3 : index
    %c0_19 = arith.constant 0 : index
    %c0_20 = arith.constant 0 : index
    %16 = vector.load %arg2[%c3, %c0_19, %c0_20] : memref<8x16x32xf32, #tpu.memory_space<vmem>>, vector<1x16x32xf32>
    %17 = vector.shape_cast %16 : vector<1x16x32xf32> to vector<16x32xf32>
    %c3_21 = arith.constant 3 : index
    %c0_22 = arith.constant 0 : index
    %c0_23 = arith.constant 0 : index
    %18 = vector.load %arg3[%c3_21, %c0_22, %c0_23] : memref<8x32x16xf32, #tpu.memory_space<vmem>>, vector<1x32x16xf32>
    %19 = vector.shape_cast %18 : vector<1x32x16xf32> to vector<32x16xf32>
    %cst_24 = arith.constant dense<0.000000e+00> : vector<16x16xf32>
    %20 = tpu.matmul %17, %19, %cst_24 {dimension_numbers = #tpu.dot_dimension_numbers<[1], [0], [0], [1], [0, 0, 1, 1], [], []>} : vector<16x32xf32>, vector<32x16xf32>, vector<16x16xf32> -> vector<16x16xf32>
    %c4 = arith.constant 4 : index
    %c0_25 = arith.constant 0 : index
    %c0_26 = arith.constant 0 : index
    %21 = vector.load %arg2[%c4, %c0_25, %c0_26] : memref<8x16x32xf32, #tpu.memory_space<vmem>>, vector<1x16x32xf32>
    %22 = vector.shape_cast %21 : vector<1x16x32xf32> to vector<16x32xf32>
    %c4_27 = arith.constant 4 : index
    %c0_28 = arith.constant 0 : index
    %c0_29 = arith.constant 0 : index
    %23 = vector.load %arg3[%c4_27, %c0_28, %c0_29] : memref<8x32x16xf32, #tpu.memory_space<vmem>>, vector<1x32x16xf32>
    %24 = vector.shape_cast %23 : vector<1x32x16xf32> to vector<32x16xf32>
    %cst_30 = arith.constant dense<0.000000e+00> : vector<16x16xf32>
    %25 = tpu.matmul %22, %24, %cst_30 {dimension_numbers = #tpu.dot_dimension_numbers<[1], [0], [0], [1], [0, 0, 1, 1], [], []>} : vector<16x32xf32>, vector<32x16xf32>, vector<16x16xf32> -> vector<16x16xf32>
    %c5 = arith.constant 5 : index
    %c0_31 = arith.constant 0 : index
    %c0_32 = arith.constant 0 : index
    %26 = vector.load %arg2[%c5, %c0_31, %c0_32] : memref<8x16x32xf32, #tpu.memory_space<vmem>>, vector<1x16x32xf32>
    %27 = vector.shape_cast %26 : vector<1x16x32xf32> to vector<16x32xf32>
    %c5_33 = arith.constant 5 : index
    %c0_34 = arith.constant 0 : index
    %c0_35 = arith.constant 0 : index
    %28 = vector.load %arg3[%c5_33, %c0_34, %c0_35] : memref<8x32x16xf32, #tpu.memory_space<vmem>>, vector<1x32x16xf32>
    %29 = vector.shape_cast %28 : vector<1x32x16xf32> to vector<32x16xf32>
    %cst_36 = arith.constant dense<0.000000e+00> : vector<16x16xf32>
    %30 = tpu.matmul %27, %29, %cst_36 {dimension_numbers = #tpu.dot_dimension_numbers<[1], [0], [0], [1], [0, 0, 1, 1], [], []>} : vector<16x32xf32>, vector<32x16xf32>, vector<16x16xf32> -> vector<16x16xf32>
    %c6 = arith.constant 6 : index
    %c0_37 = arith.constant 0 : index
    %c0_38 = arith.constant 0 : index
    %31 = vector.load %arg2[%c6, %c0_37, %c0_38] : memref<8x16x32xf32, #tpu.memory_space<vmem>>, vector<1x16x32xf32>
    %32 = vector.shape_cast %31 : vector<1x16x32xf32> to vector<16x32xf32>
    %c6_39 = arith.constant 6 : index
    %c0_40 = arith.constant 0 : index
    %c0_41 = arith.constant 0 : index
    %33 = vector.load %arg3[%c6_39, %c0_40, %c0_41] : memref<8x32x16xf32, #tpu.memory_space<vmem>>, vector<1x32x16xf32>
    %34 = vector.shape_cast %33 : vector<1x32x16xf32> to vector<32x16xf32>
    %cst_42 = arith.constant dense<0.000000e+00> : vector<16x16xf32>
    %35 = tpu.matmul %32, %34, %cst_42 {dimension_numbers = #tpu.dot_dimension_numbers<[1], [0], [0], [1], [0, 0, 1, 1], [], []>} : vector<16x32xf32>, vector<32x16xf32>, vector<16x16xf32> -> vector<16x16xf32>
    %c7 = arith.constant 7 : index
    %c0_43 = arith.constant 0 : index
    %c0_44 = arith.constant 0 : index
    %36 = vector.load %arg2[%c7, %c0_43, %c0_44] : memref<8x16x32xf32, #tpu.memory_space<vmem>>, vector<1x16x32xf32>
    %37 = vector.shape_cast %36 : vector<1x16x32xf32> to vector<16x32xf32>
    %c7_45 = arith.constant 7 : index
    %c0_46 = arith.constant 0 : index
    %c0_47 = arith.constant 0 : index
    %38 = vector.load %arg3[%c7_45, %c0_46, %c0_47] : memref<8x32x16xf32, #tpu.memory_space<vmem>>, vector<1x32x16xf32>
    %39 = vector.shape_cast %38 : vector<1x32x16xf32> to vector<32x16xf32>
    %cst_48 = arith.constant dense<0.000000e+00> : vector<16x16xf32>
    %40 = tpu.matmul %37, %39, %cst_48 {dimension_numbers = #tpu.dot_dimension_numbers<[1], [0], [0], [1], [0, 0, 1, 1], [], []>} : vector<16x32xf32>, vector<32x16xf32>, vector<16x16xf32> -> vector<16x16xf32>
    %41 = tpu.concatenate %5, %10, %15, %20, %25, %30, %35, %40 in 1 : vector<16x16xf32>, vector<16x16xf32>, vector<16x16xf32>, vector<16x16xf32>, vector<16x16xf32>, vector<16x16xf32>, vector<16x16xf32>, vector<16x16xf32> -> vector<16x128xf32>
    %cst_49 = arith.constant dense<0.000000e+00> : vector<8x128xf32>
    %42 = tpu.matmul %0, %41, %cst_49 {dimension_numbers = #tpu.dot_dimension_numbers<[1], [0], [0], [1], [0, 0, 1, 1], [], []>} : vector<8x16xf32>, vector<16x128xf32>, vector<8x128xf32> -> vector<8x128xf32>
    %c0_50 = arith.constant 0 : index
    %c0_51 = arith.constant 0 : index
    %43 = vector.load %arg4[%c0_50, %c0_51] : memref<1x128xf32, #tpu.memory_space<vmem>>, vector<1x128xf32>
    %44 = vector.broadcast %43 : vector<1x128xf32> to vector<8x128xf32>
    %45 = arith.addf %42, %44 : vector<8x128xf32>
    %c0_52 = arith.constant 0 : index
    %c0_53 = arith.constant 0 : index
    %46 = vector.load %arg5[%c0_52, %c0_53] : memref<8x128xf32, #tpu.memory_space<vmem>>, vector<8x128xf32>
    tpu.vector_store %arg5[%c0_52, %c0_53], %45 {strides = array<i32>} : memref<8x128xf32, #tpu.memory_space<vmem>>, vector<8x128xf32>,
    return
  }
  func.func @transform_0(%arg0: i32) -> (i32, i32) {
    %c0_i32 = arith.constant 0 : i32
    %c0_i32_0 = arith.constant 0 : i32
    return %arg0, %c0_i32 : i32, i32
  }
  func.func @transform_1(%arg0: i32) -> (i32, i32, i32) {
    %c0_i32 = arith.constant 0 : i32
    %c0_i32_0 = arith.constant 0 : i32
    %c0_i32_1 = arith.constant 0 : i32
    %c0_i32_2 = arith.constant 0 : i32
    return %c0_i32, %c0_i32_0, %c0_i32_1 : i32, i32, i32
  }
  func.func @transform_2(%arg0: i32) -> (i32, i32, i32) {
    %c0_i32 = arith.constant 0 : i32
    %c0_i32_0 = arith.constant 0 : i32
    %c0_i32_1 = arith.constant 0 : i32
    %c0_i32_2 = arith.constant 0 : i32
    return %c0_i32, %c0_i32_0, %c0_i32_1 : i32, i32, i32
  }
  func.func @transform_3(%arg0: i32) -> (i32, i32) {
    %c0_i32 = arith.constant 0 : i32
    %c0_i32_0 = arith.constant 0 : i32
    %c0_i32_1 = arith.constant 0 : i32
    return %c0_i32, %c0_i32_0 : i32, i32
  }
  func.func @transform_4(%arg0: i32) -> (i32, i32) {
    %c0_i32 = arith.constant 0 : i32
    %c0_i32_0 = arith.constant 0 : i32
    return %arg0, %c0_i32 : i32, i32
  }
}

</mosaic_0001>

<bundles_post_ra>
// kernel: tpu_custom_call.1
= control target key start
LH: loop header
LB: loop body
LE: loop exit
PB: predicated region body
PF: predicated region fallthrough
CT: control target
= control target key end

     0   :  { %vm25_vm0 = vcmask 261120   ;;  %s1463_s0 = inlined_call_operand.vmem [shape: f32[8,16], index: 0, kind: input, shape index: {}]   ;;  %s1464_s1 = inlined_call_operand.vmem [shape: f32[8,16,32], index: 1, kind: input, shape index: {}]   ;;  %s1465_s2 = inlined_call_operand.vmem [shape: f32[8,32,16], index: 2, kind: input, shape index: {}]   ;;  %s1466_s3 = inlined_call_operand.vmem [shape: f32[1,128], index: 3, kind: input, shape index: {}]   ;;  %s1467_s4 = inlined_call_operand.hbm [shape: f32[8,128], index: 4, kind: output, shape index: {}]  }
   0x1   :  { %v21_v0 = vld [vmem:[%s1465_s2] sm:$0xff]  ;;  %v22_v1 = vld [vmem:[%s1465_s2 + $0x8] sm:$0xff]  ;;  %v23_v5 = vld [vmem:[%s1465_s2 + $0x10] sm:$0xff] }
   0x2   :  { %v905_v2 = vld [vmem:[%s1465_s2 + $0x20] sm:$0xff]  ;;  %v1107_v3 = vpack.c.bf16 %v22_v1, %v21_v0  ;;  %v906_v4 = vld [vmem:[%s1465_s2 + $0x28] sm:$0xff]  ;;  %v24_v6 = vld [vmem:[%s1465_s2 + $0x18] sm:$0xff] }
   0x3   :  { %v1115_v7 = vpack.c.bf16 %v906_v4, %v905_v2  ;;  %v1111_v8 = vpack.c.bf16 %v24_v6, %v23_v5  ;;  %v907_v9 = vld [vmem:[%s1465_s2 + $0x30] sm:$0xff]  ;;  %v908_v10 = vld [vmem:[%s1465_s2 + $0x38] sm:$0xff]  ;;  %v19_v11 = vld [vmem:[%s1464_s1] sm:$0xff] }
   0x4   :  { %1108 = vmatprep.subr.bf16.mxu0 %v1107_v3  ;;  %v1119_v12 = vpack.c.bf16 %v908_v10, %v907_v9  ;;  %1020 = vmatprep.mubr.msk.f32.mxu0 %vm25_vm0, %v19_v11  ;;  %v903_v13 = vld [vmem:[%s1464_s1 + $0x10] sm:$0xff]  ;;  %v913_v14 = vld [vmem:[%s1465_s2 + $0x40] sm:$0xff]  ;;  %v914_v15 = vld [vmem:[%s1465_s2 + $0x48] sm:$0xff] }
   0x5   :  { %1116 = vmatprep.subr.bf16.mxu1 %v1115_v7  ;;  %1110 = vmatpush3.bf16.msra.mxu0 %v1107_v3  ;;  %v921_v16 = vld [vmem:[%s1465_s2 + $0x60] sm:$0xff]  ;;  %v1123_v17 = vpack.c.bf16 %v914_v15, %v913_v14  ;;  %v922_v18 = vld [vmem:[%s1465_s2 + $0x68] sm:$0xff]  ;;  %v915_v20 = vld [vmem:[%s1465_s2 + $0x50] sm:$0xff] }
   0x6   :  { %1118 = vmatpush3.bf16.msra.mxu1 %v1115_v7  ;;  %1112 = vmatprep.subr.bf16.mxu0 %v1111_v8  ;;  %v1131_v19 = vpack.c.bf16 %v922_v18, %v921_v16  ;;  %v916_v21 = vld [vmem:[%s1465_s2 + $0x58] sm:$0xff]  ;;  %v923_v22 = vld [vmem:[%s1465_s2 + $0x70] sm:$0xff]  ;;  %v20_v24 = vld [vmem:[%s1464_s1 + $0x8] sm:$0xff] }
   0x7   :  { %1120 = vmatprep.subr.bf16.mxu1 %v1119_v12  ;;  %1031 = vmatprep.mubr.msk.f32.mxu1 %vm25_vm0, %v903_v13  ;;  %v924_v23 = vld [vmem:[%s1465_s2 + $0x78] sm:$0xff]  ;;  %v1127_v26 = vpack.c.bf16 %v916_v21, %v915_v20  ;;  %v929_v28 = vld [vmem:[%s1465_s2 + $0x80] sm:$0xff]  ;;  %v930_v29 = vld [vmem:[%s1465_s2 + $0x88] sm:$0xff] }
   0x8   :  { %v904_v25 = vld [vmem:[%s1464_s1 + $0x18] sm:$0xff]  ;;  %v1135_v27 = vpack.c.bf16 %v924_v23, %v923_v22  ;;  %v911_v30 = vld [vmem:[%s1464_s1 + $0x20] sm:$0xff]  ;;  %v938_v32 = vld [vmem:[%s1465_s2 + $0xa8] sm:$0xff]  ;;  %v1139_v34 = vpack.c.bf16 %v930_v29, %v929_v28 }
   0x9   :  { %1114 = vmatpush3.bf16.msra.mxu0 %v1111_v8  ;;  %v937_v31 = vld [vmem:[%s1465_s2 + $0xa0] sm:$0xff]  ;;  %v919_v33 = vld [vmem:[%s1464_s1 + $0x30] sm:$0xff]  ;;  %v932_v37 = vld [vmem:[%s1465_s2 + $0x98] sm:$0xff] }
   0xa   :  { %1122 = vmatpush3.bf16.msra.mxu1 %v1119_v12  ;;  %1124 = vmatprep.subr.bf16.mxu0 %v1123_v17  ;;  %v1147_v35 = vpack.c.bf16 %v938_v32, %v937_v31  ;;  %v931_v36 = vld [vmem:[%s1465_s2 + $0x90] sm:$0xff]  ;;  %v940_v39 = vld [vmem:[%s1465_s2 + $0xb8] sm:$0xff]  ;;  %v912_v40 = vld [vmem:[%s1464_s1 + $0x28] sm:$0xff] }
   0xb   :  { %1132 = vmatprep.subr.bf16.mxu1 %v1131_v19  ;;  %v939_v38 = vld [vmem:[%s1465_s2 + $0xb0] sm:$0xff] }
   0xc   :  { %1021 = vmatmul.mubr.msk.f32.vlgmr.msra.gmra.mrb[0].mxu0 %vm25_vm0, %v20_v24 }
   0xd   :  { %1032 = vmatmul.mubr.msk.f32.vlgmr.msra.gmra.mrb[0].mxu1 %vm25_vm0, %v904_v25  ;;  %1126 = vmatpush3.bf16.msra.mxu0 %v1123_v17 }
   0xe   :  { %1134 = vmatpush3.bf16.msra.mxu1 %v1131_v19  ;;  %1128 = vmatprep.subr.bf16.mxu0 %v1127_v26 }
   0xf   :  { %1136 = vmatprep.subr.bf16.mxu1 %v1135_v27  ;;  %1042 = vmatprep.mubr.msk.f32.mxu0 %vm25_vm0, %v911_v30 }
  0x10   :  { %1053 = vmatprep.mubr.msk.f32.mxu1 %vm25_vm0, %v919_v33 }
  0x11   :  { %1130 = vmatpush3.bf16.msra.mxu0 %v1127_v26 }
  0x12   :  { %9 = vsyncpa [#allocation3], 0  ;;  %1138 = vmatpush3.bf16.msra.mxu1 %v1135_v27  ;;  %1140 = vmatprep.subr.bf16.mxu0 %v1139_v34  ;;  %v920_v41 = vld [vmem:[%s1464_s1 + $0x38] sm:$0xff]  ;;  %v1143_v42 = vpack.c.bf16 %v932_v37, %v931_v36  ;;  %v1151_v43 = vpack.c.bf16 %v940_v39, %v939_v38  ;;  %v945_v44 = vld [vmem:[%s1465_s2 + $0xc0] sm:$0xff]  ;;  %s1244_s6 = smov 16   ;;  %s1245_s7 = smov 32  }
  0x13   :  { %1148 = vmatprep.subr.bf16.mxu1 %v1147_v35  ;;  %v946_v45 = vld [vmem:[%s1465_s2 + $0xc8] sm:$0xff]  ;;  %v927_v46 = vld [vmem:[%s1464_s1 + $0x40] sm:$0xff]  ;;  %v935_v49 = vld [vmem:[%s1464_s1 + $0x50] sm:$0xff]  ;;  %v1247_v17 = vmov 0.0|0.0   ;;  %s1248_s8 = smov 64   ;;  %s1249_s9 = smov 80  }
  0x14   :  { %1043 = vmatmul.mubr.msk.f32.vlgmr.msra.gmra.mrb[2].mxu0 %vm25_vm0, %v912_v40  ;;  %v953_v47 = vld [vmem:[%s1465_s2 + $0xe0] sm:$0xff]  ;;  %v954_v48 = vld [vmem:[%s1465_s2 + $0xe8] sm:$0xff]  ;;  %v1155_v50 = vpack.c.bf16 %v946_v45, %v945_v44  ;;  %v947_v52 = vld [vmem:[%s1465_s2 + $0xd0] sm:$0xff]  ;;  %vm1250_vm1 = vmmov 0   ;;  %v1251_v18 = vmov 0.0   ;;  %s1252_s10 = smov 96  }
  0x15   :  { %1054 = vmatmul.mubr.msk.f32.vlgmr.msra.gmra.mrb[2].mxu1 %vm25_vm0, %v920_v41  ;;  %1142 = vmatpush3.bf16.msra.mxu0 %v1139_v34  ;;  %v1163_v51 = vpack.c.bf16 %v954_v48, %v953_v47  ;;  %v948_v53 = vld [vmem:[%s1465_s2 + $0xd8] sm:$0xff]  ;;  %v955_v54 = vld [vmem:[%s1465_s2 + $0xf0] sm:$0xff]  ;;  %v928_v56 = vld [vmem:[%s1464_s1 + $0x48] sm:$0xff]  ;;  %s1253_s11 = smov 112   ;;  %vm786_vm2 = vcmask 130048   ;;  %vm791_vm3 = vcmask 392192  }
  0x16   :  { %1150 = vmatpush3.bf16.msra.mxu1 %v1147_v35  ;;  %1144 = vmatprep.subr.bf16.mxu0 %v1143_v42  ;;  %v956_v55 = vld [vmem:[%s1465_s2 + $0xf8] sm:$0xff]  ;;  %v1159_v58 = vpack.c.bf16 %v948_v53, %v947_v52  ;;  %v943_v60 = vld [vmem:[%s1464_s1 + $0x60] sm:$0xff]  ;;  %v951_v61 = vld [vmem:[%s1464_s1 + $0x70] sm:$0xff]  ;;  %vm794_vm4 = vcmask 523264   ;;  %vm797_vm5 = vcmask 654336   ;;  %vm800_vm6 = vcmask 785408  }
  0x17   :  { %1152 = vmatprep.subr.bf16.mxu1 %v1151_v43  ;;  %1064 = vmatprep.mubr.msk.f32.mxu0 %vm25_vm0, %v927_v46  ;;  %v936_v57 = vld [vmem:[%s1464_s1 + $0x58] sm:$0xff]  ;;  %v1167_v59 = vpack.c.bf16 %v956_v55, %v955_v54  ;;  %v944_v62 = vld [vmem:[%s1464_s1 + $0x68] sm:$0xff]  ;;  %vm803_vm7 = vcmask 916480   ;;  %s1254_s16 = smov [#allocation2]  }
  0x18   :  { %1075 = vmatprep.mubr.msk.f32.mxu1 %vm25_vm0, %v935_v49  ;;  %v952_v63 = vld [vmem:[%s1464_s1 + $0x78] sm:$0xff]  ;;  %s1246_s1 = smov 48   ;;  %s893_s17 = sshll.u32 %s1254_s16, 4  ;;  %s894_s17 = int_to_ptr.vmem [resolvable:$true] %s893_s17 }
  0x19   :  { %1146 = vmatpush3.bf16.msra.mxu0 %v1143_v42  ;;  %s1220_s18 = scalar_lea.vmem %s894_s17, 128  ;;  %p1225_p1 = scmp.lt.s32.totalorder %s894_s17, %s894_s17 }
  0x1a   :  { %1154 = vmatpush3.bf16.msra.mxu1 %v1151_v43  ;;  %1156 = vmatprep.subr.bf16.mxu0 %v1155_v50  ;;  %p1221_p0 = scmp.ne.s32.totalorder %s894_s17, %s1220_s18  ;;  %p1226_p2 = scmp.lt.s32.totalorder %s1220_s18, %s1220_s18 }
  0x1b   :  { %1164 = vmatprep.subr.bf16.mxu1 %v1163_v51 }
  0x1c   :  { %1065 = vmatmul.mubr.msk.f32.vlgmr.msra.gmra.mrb[4].mxu0 %vm25_vm0, %v928_v56  ;;  %p1227_p3 = por %p1226_p2, %p1225_p1 }
  0x1d   :  { %1076 = vmatmul.mubr.msk.f32.vlgmr.msra.gmra.mrb[4].mxu1 %vm25_vm0, %v936_v57  ;;  %1158 = vmatpush3.bf16.msra.mxu0 %v1155_v50 }
  0x1e   :  { %1166 = vmatpush3.bf16.msra.mxu1 %v1163_v51  ;;  %1160 = vmatprep.subr.bf16.mxu0 %v1159_v58  ;;  %p1228_p4 = pnand %p1227_p3, %p1221_p0 }
  0x1f   :  { %1168 = vmatprep.subr.bf16.mxu1 %v1167_v59  ;;  %1086 = vmatprep.mubr.msk.f32.mxu0 %vm25_vm0, %v943_v60 }
  0x20   :  { %1097 = vmatprep.mubr.msk.f32.mxu1 %vm25_vm0, %v951_v61  ;;  %v18_v61 = vld [vmem:[%s1463_s0] sm:$0xff] }
  0x21   :  { %1162 = vmatpush3.bf16.msra.mxu0 %v1159_v58 }
  0x22   :  { %1170 = vmatpush3.bf16.msra.mxu1 %v1167_v59  ;;  %1171 = vmatprep.subr.bf16.mxu0 %v1247_v17 }
  0x24   :  { %1087 = vmatmul.mubr.msk.f32.vlgmr.msra.gmra.mrb[6].mxu0 %vm25_vm0, %v944_v62  ;;  %v959_v62 = vld [vmem:[%s1466_s3] ss:$0 sm:$0xff] }
  0x25   :  { %1098 = vmatmul.mubr.msk.f32.vlgmr.msra.gmra.mrb[6].mxu1 %vm25_vm0, %v952_v63  ;;  %1104 = vmatprep.mubr.msk.f32.mxu0 %vm1250_vm1, %v1251_v18 }
  0xdf   :  { %v1022_v0 = vpop.f32.mrb[0].mxu0 }
  0xe0   :  { %v1033_v1 = vpop.f32.mrb[0].mxu1  ;;  %v98_v2 = vpop.f32.mrb[1].mxu0 }
  0xe1   :  { %v187_v3 = vpop.f32.mrb[1].mxu1 }
  0xe2   :  { %v1185_v4 = vpack.i.bf16 %v1033_v1, %v187_v3 }
  0xe4   :  { %1186 = vrot.lane.b32.xlu0 %v1185_v4, %s1244_s6 }
  0xe7   :  { %v1044_v5 = vpop.f32.mrb[2].mxu0 }
  0xe8   :  { %v276_v6 = vpop.f32.mrb[3].mxu0  ;;  %v1055_v7 = vpop.f32.mrb[2].mxu1 }
  0xe9   :  { %v1190_v8 = vpack.i.bf16 %v1044_v5, %v276_v6  ;;  %v365_v9 = vpop.f32.mrb[3].mxu1 }
  0xea   :  { %v1195_v10 = vpack.i.bf16 %v1055_v7, %v365_v9 }
  0xeb   :  { %1191 = vrot.lane.b32.xlu0 %v1190_v8, %s1245_s7 }
  0xec   :  { %1196 = vrot.lane.b32.xlu1 %v1195_v10, %s1246_s1 }
  0xef   :  { %v1066_v11 = vpop.f32.mrb[4].mxu0 }
  0xf0   :  { %v454_v12 = vpop.f32.mrb[5].mxu0  ;;  %v1077_v13 = vpop.f32.mrb[4].mxu1 }
  0xf1   :  { %v1200_v14 = vpack.i.bf16 %v1066_v11, %v454_v12  ;;  %v543_v15 = vpop.f32.mrb[5].mxu1 }
  0xf2   :  { %v1205_v16 = vpack.i.bf16 %v1077_v13, %v543_v15 }
  0xf3   :  { %1201 = vrot.lane.b32.xlu1 %v1200_v14, %s1248_s8 }
  0xf4   :  { %1206 = vrot.lane.b32.xlu0 %v1205_v16, %s1249_s9 }
  0xf7   :  { %v1088_v19 = vpop.f32.mrb[6].mxu0 }
  0xf8   :  { %v1099_v20 = vpop.f32.mrb[6].mxu1  ;;  %v632_v21 = vpop.f32.mrb[7].mxu0 }
  0xf9   :  { %v1210_v22 = vpack.i.bf16 %v1088_v19, %v632_v21  ;;  %v721_v23 = vpop.f32.mrb[7].mxu1 }
  0xfa   :  { %v1215_v24 = vpack.i.bf16 %v1099_v20, %v721_v23 }
  0xfb   :  { %1211 = vrot.lane.b32.xlu1 %v1210_v22, %s1252_s10 }
  0xfc   :  { %1216 = vrot.lane.b32.xlu0 %v1215_v24, %s1253_s11 }
 0x156   :  { %v1187_v25 = vpop.permute.xlu0 %1186 }
 0x157   :  { %v1189_v28 = vunpack.i.h.bf16 %v1187_v25  ;;  %v1188_v29 = vunpack.i.l.bf16 %v1187_v25 }
 0x159   :  { %v787_v33 = vsel %vm786_vm2, %v98_v2, %v1188_v29  ;;  %v788_v34 = vsel %vm786_vm2, %v1022_v0, %v1189_v28 }
 0x15d   :  { %v1192_v26 = vpop.permute.xlu0 %1191 }
 0x15e   :  { %v1197_v27 = vpop.permute.xlu1 %1196  ;;  %v1194_v30 = vunpack.i.h.bf16 %v1192_v26  ;;  %v1193_v31 = vunpack.i.l.bf16 %v1192_v26 }
 0x15f   :  { %v1199_v35 = vunpack.i.h.bf16 %v1197_v27  ;;  %v1198_v36 = vunpack.i.l.bf16 %v1197_v27 }
 0x160   :  { %v790_v37 = vsel %vm25_vm0, %v788_v34, %v1194_v30  ;;  %v789_v38 = vsel %vm25_vm0, %v787_v33, %v1193_v31 }
 0x161   :  { %v792_v42 = vsel %vm791_vm3, %v789_v38, %v1198_v36  ;;  %v793_v43 = vsel %vm791_vm3, %v790_v37, %v1199_v35 }
 0x165   :  { %v1202_v32 = vpop.permute.xlu1 %1201 }
 0x166   :  { %v1204_v39 = vunpack.i.h.bf16 %v1202_v32  ;;  %v1203_v40 = vunpack.i.l.bf16 %v1202_v32  ;;  %v1207_v41 = vpop.permute.xlu0 %1206 }
 0x167   :  { %v1209_v44 = vunpack.i.h.bf16 %v1207_v41  ;;  %v1208_v45 = vunpack.i.l.bf16 %v1207_v41 }
 0x168   :  { %v796_v46 = vsel %vm794_vm4, %v793_v43, %v1204_v39  ;;  %v795_v47 = vsel %vm794_vm4, %v792_v42, %v1203_v40 }
 0x169   :  { %v798_v52 = vsel %vm797_vm5, %v795_v47, %v1208_v45  ;;  %v799_v53 = vsel %vm797_vm5, %v796_v46, %v1209_v44 }
 0x16d   :  { %v1212_v48 = vpop.permute.xlu1 %1211 }
 0x16e   :  { %v1217_v49 = vpop.permute.xlu0 %1216  ;;  %v1214_v50 = vunpack.i.h.bf16 %v1212_v48  ;;  %v1213_v51 = vunpack.i.l.bf16 %v1212_v48 }
 0x16f   :  { %v1219_v54 = vunpack.i.h.bf16 %v1217_v49  ;;  %v1218_v55 = vunpack.i.l.bf16 %v1217_v49 }
 0x170   :  { %v802_v56 = vsel %vm800_vm6, %v799_v53, %v1214_v50  ;;  %v801_v57 = vsel %vm800_vm6, %v798_v52, %v1213_v51 }
 0x171   :  { %v805_v58 = vsel %vm803_vm7, %v802_v56, %v1219_v54  ;;  %v804_v59 = vsel %vm803_vm7, %v801_v57, %v1218_v55 }
 0x172   :  { %v1172_v60 = vpack.c.bf16 %v805_v58, %v804_v59 }
 0x174   :  { %1173 = vmatpush3.bf16.msra.mxu0 %v1172_v60 }
 0x177   :  { %1105 = vmatmul.mubr.msk.f32.vlgmr.msra.gmra.mrb[8].mxu0 %vm786_vm2, %v18_v61 }
 0x24a   :  { %v882_v63 = vpop.f32.mrb[8].mxu0 }
 0x24b   :  { %v883_v0 = vadd.f32 %v959_v62, %v882_v63  ;;  %v1106_v1 = vpop.f32.mrb[9].mxu0 }
 0x24d   :  { %886 = vst [vmem:[#allocation2] sm:$0xff] %v883_v0 }
 0x24e   :  { %1231 = shalt.err (!%p1228_p4)
}
 0x24f   :  { %s1232_s20 = scalar_lea.hbm %s1467_s4, 128 }
 0x250   :  { %p1233_p5 = scmp.ne.s32.totalorder %s1467_s4, %s1232_s20  ;;  %p1236_p6 = scmp.lt.u32.totalorder %s1232_s20, %s1467_s4 }
 0x252   :  { %p1238_p7 = pnand %p1236_p6, %p1233_p5 }
 0x254   :  { %1241 = shalt.err (!%p1238_p7)
}
 0x255   :  { %896 = dma.vmem_to_hbm [thread:$0]  %s894_s17, 128, %s1467_s4, [#allocation3]  }
 0x256   :  { %1242 = dma.done.wait [#allocation3], 128  }
 0x257   :  { %1243 = vsyncadd [#allocation3], 4294967168 }
 0x258   :  { %900 = vsyncpa [#allocation3], 1 }

</bundles_post_ra>
